<compile_context>
chip_gen: v7x
topology: tpu7x:2x2x1
jax: 0.10.0
libtpu: 0.0.40
codegen_flags: <defaults>
</compile_context>

<pallas_src>
import jax
import jax.numpy as jnp
from jax import lax
from jax.experimental import pallas as pl
from jax.experimental.pallas import tpu as pltpu


def _heatmap_regression_kernel(x_ref, w_ref, b_ref, o_ref):
    # x: (TB, D) f32, w: (P, D) f32 (PyTorch nn.Linear layout), b: (1, P) f32.
    # Contract the D axes directly (x @ w.T) -- no transpose materialized.
    y = lax.dot_general(
        x_ref[...],
        w_ref[...],
        dimension_numbers=(((1,), (1,)), ((), ())),
        preferred_element_type=jnp.float32,
    )
    o_ref[...] = (y + b_ref[...]).astype(o_ref.dtype)


def heatmap_regression_forward(x, weight, bias):
    """x: (B, ...) f32 with prod(...) == D; weight: (P, D) f32; bias: (P,) f32.
    Returns (B, P) f32 == x.view(B, -1) @ weight.T + bias."""
    B = x.shape[0]
    P, D = weight.shape
    x2 = x.reshape(B, D)          # flatten, matches x.view(x.size(0), -1)
    b2 = bias.reshape(1, P)

    # Batch tile: whole batch if small (full-dim blocks are always legal),
    # otherwise a multiple-of-8 tile so the sublane constraint holds.
    if B <= 256:
        tb = B
    else:
        tb = 256
    grid = (pl.cdiv(B, tb),)

    itemsize = 4  # f32
    cost = pl.CostEstimate(
        flops=2 * B * D * P,
        transcendentals=0,
        bytes_accessed=(B * D + P * D + P + B * P) * itemsize,
    )

    return pl.pallas_call(
        _heatmap_regression_kernel,
        out_shape=jax.ShapeDtypeStruct((B, P), jnp.float32),
        grid_spec=pltpu.PrefetchScalarGridSpec(
            num_scalar_prefetch=0,
            grid=grid,
            in_specs=[
                pl.BlockSpec((tb, D), lambda i: (i, 0)),   # activations (batch-tiled)
                pl.BlockSpec((P, D), lambda i: (0, 0)),    # weight, PyTorch layout, resident
                pl.BlockSpec((1, P), lambda i: (0, 0)),    # bias, resident
            ],
            out_specs=pl.BlockSpec((tb, P), lambda i: (i, 0)),
        ),
        compiler_params=pltpu.CompilerParams(
            dimension_semantics=("parallel",),
        ),
        cost_estimate=cost,
    )(x2, weight, b2)


if __name__ == "__main__":
    # Shapes implied by the module: heatmaps of 31x31, output_dim=6, batch=2.
    batch, side, output_dim = 2, 31, 6
    D = side * side  # 961

    key = jax.random.PRNGKey(0)
    kx, kw, kb = jax.random.split(key, 3)

    x = jax.random.normal(kx, (batch, side, side), dtype=jnp.float32)
    # Deterministic synthetic parameters matching nn.Linear(961, 6) shapes.
    weight = jax.random.normal(kw, (output_dim, D), dtype=jnp.float32) * 0.02
    bias = jax.random.normal(kb, (output_dim,), dtype=jnp.float32) * 0.01

    out = heatmap_regression_forward(x, weight, bias)
    out = jax.block_until_ready(out)

    # Pure-JAX reference (same math as the PyTorch forward).
    y_ref = x.reshape(batch, D) @ weight.T + bias
    assert out.shape == (batch, output_dim)
    assert jnp.allclose(out, y_ref, atol=1e-4, rtol=1e-4)

    print("KERNEL_OK")
</pallas_src>

<mosaic_0001>
module attributes {stable_mosaic.version = 11 : i64} {
  func.func @_heatmap_regression_kernel(%arg0: i32, %arg1: memref<2x961xf32, #tpu.memory_space<vmem>>, %arg2: memref<6x961xf32, #tpu.memory_space<vmem>>, %arg3: memref<1x6xf32, #tpu.memory_space<vmem>>, %arg4: memref<2x6xf32, #tpu.memory_space<vmem>>) attributes {dimension_semantics = [#tpu.dimension_semantics<parallel>], iteration_bounds = array<i64: 1>, scalar_prefetch = 0 : i64, scratch_operands = 0 : i64, tpu.core_type = #tpu.core_type<tc>, window_params = [{transform_indices = @transform_0, window_bounds = array<i64: 2, 961>}, {pipeline_mode = #tpu.pipeline_mode<synchronous>, transform_indices = @transform_1, window_bounds = array<i64: 6, 961>}, {pipeline_mode = #tpu.pipeline_mode<synchronous>, transform_indices = @transform_2, window_bounds = array<i64: 1, 6>}, {transform_indices = @transform_3, window_bounds = array<i64: 2, 6>}]} {
    %c0 = arith.constant 0 : index
    %c0_0 = arith.constant 0 : index
    %0 = vector.load %arg1[%c0, %c0_0] : memref<2x961xf32, #tpu.memory_space<vmem>>, vector<2x961xf32>
    %c0_1 = arith.constant 0 : index
    %c0_2 = arith.constant 0 : index
    %1 = vector.load %arg2[%c0_1, %c0_2] : memref<6x961xf32, #tpu.memory_space<vmem>>, vector<6x961xf32>
    %cst = arith.constant dense<0.000000e+00> : vector<2x6xf32>
    %2 = tpu.matmul %0, %1, %cst {dimension_numbers = #tpu.dot_dimension_numbers<[1], [1], [0], [0], [0, 0, 1, 0], [], []>} : vector<2x961xf32>, vector<6x961xf32>, vector<2x6xf32> -> vector<2x6xf32>
    %c0_3 = arith.constant 0 : index
    %c0_4 = arith.constant 0 : index
    %3 = vector.load %arg3[%c0_3, %c0_4] : memref<1x6xf32, #tpu.memory_space<vmem>>, vector<1x6xf32>
    %4 = vector.broadcast %3 : vector<1x6xf32> to vector<2x6xf32>
    %5 = arith.addf %2, %4 : vector<2x6xf32>
    %c0_5 = arith.constant 0 : index
    %c0_6 = arith.constant 0 : index
    %6 = vector.load %arg4[%c0_5, %c0_6] : memref<2x6xf32, #tpu.memory_space<vmem>>, vector<2x6xf32>
    tpu.vector_store %arg4[%c0_5, %c0_6], %5 {strides = array<i32>} : memref<2x6xf32, #tpu.memory_space<vmem>>, vector<2x6xf32>,
    return
  }
  func.func @transform_0(%arg0: i32) -> (i32, i32) {
    %c0_i32 = arith.constant 0 : i32
    %c0_i32_0 = arith.constant 0 : i32
    return %arg0, %c0_i32 : i32, i32
  }
  func.func @transform_1(%arg0: i32) -> (i32, i32) {
    %c0_i32 = arith.constant 0 : i32
    %c0_i32_0 = arith.constant 0 : i32
    %c0_i32_1 = arith.constant 0 : i32
    return %c0_i32, %c0_i32_0 : i32, i32
  }
  func.func @transform_2(%arg0: i32) -> (i32, i32) {
    %c0_i32 = arith.constant 0 : i32
    %c0_i32_0 = arith.constant 0 : i32
    %c0_i32_1 = arith.constant 0 : i32
    return %c0_i32, %c0_i32_0 : i32, i32
  }
  func.func @transform_3(%arg0: i32) -> (i32, i32) {
    %c0_i32 = arith.constant 0 : i32
    %c0_i32_0 = arith.constant 0 : i32
    return %arg0, %c0_i32 : i32, i32
  }
}

</mosaic_0001>

<bundles_post_ra>
// kernel: tpu_custom_call.1
= control target key start
LH: loop header
LB: loop body
LE: loop exit
PB: predicated region body
PF: predicated region fallthrough
CT: control target
= control target key end

     0   :  { %8 = vsyncpa [#allocation3], 0  ;;  %s555_s0 = inlined_call_operand.hbm [shape: f32[2,961], index: 0, kind: input, shape index: {}]   ;;  %s556_s1 = inlined_call_operand.hbm [shape: f32[6,961], index: 1, kind: input, shape index: {}]   ;;  %s557_s2 = inlined_call_operand.vmem [shape: f32[1,6], index: 2, kind: input, shape index: {}]   ;;  %s558_s3 = inlined_call_operand.hbm [shape: f32[2,6], index: 3, kind: output, shape index: {}]  }
   0x1   :  { %9 = vsyncpa [#allocation6], 0 }
   0x2   :  { %10 = vsyncpa [#allocation4], 0  ;;  %s490_s12 = smov [#allocation2]   ;;  %s491_s14 = smov [#allocation5]  }
   0x3   :  { %s17_s13 = sshll.u32 %s490_s12, 4  ;;  %s27_s15 = sshll.u32 %s491_s14, 4  ;;  %s18_s13 = int_to_ptr.vmem [resolvable:$true] %s17_s13  ;;  %s28_s15 = int_to_ptr.vmem [resolvable:$true] %s27_s15 }
   0x4   :  { %s418_s18 = scalar_lea.hbm %s555_s0, 256 }
   0x5   :  { %p419_p0 = scmp.ne.s32.totalorder %s555_s0, %s418_s18  ;;  %p422_p1 = scmp.lt.u32.totalorder %s418_s18, %s555_s0 }
   0x7   :  { %p424_p2 = pnand %p422_p1, %p419_p0 }
   0x9   :  { %427 = shalt.err (!%p424_p2)
}
   0xa   :  { %s428_s23 = scalar_lea.vmem %s18_s13, 256  ;;  %p433_p4 = scmp.lt.s32.totalorder %s18_s13, %s18_s13 }
   0xb   :  { %p429_p3 = scmp.ne.s32.totalorder %s18_s13, %s428_s23  ;;  %p434_p5 = scmp.lt.s32.totalorder %s428_s23, %s428_s23 }
   0xd   :  { %p435_p6 = por %p434_p5, %p433_p4 }
   0xf   :  { %p436_p7 = pnand %p435_p6, %p429_p3 }
  0x11   :  { %439 = shalt.err (!%p436_p7)
}
  0x12   :  { %20 = dma.hbm_to_vmem [thread:$0]  %s555_s0, 256, %s18_s13, [#allocation3]  }
  0x13   :  { %s440_s28 = scalar_lea.hbm %s556_s1, 1024 }
  0x14   :  { %p441_p8 = scmp.ne.s32.totalorder %s556_s1, %s440_s28  ;;  %p444_p9 = scmp.lt.u32.totalorder %s440_s28, %s556_s1 }
  0x16   :  { %p446_p10 = pnand %p444_p9, %p441_p8 }
  0x18   :  { %449 = shalt.err (!%p446_p10)
}
  0x19   :  { %s450_s6 = scalar_lea.vmem %s28_s15, 1024  ;;  %p455_p12 = scmp.lt.s32.totalorder %s28_s15, %s28_s15 }
  0x1a   :  { %p451_p11 = scmp.ne.s32.totalorder %s28_s15, %s450_s6  ;;  %p456_p13 = scmp.lt.s32.totalorder %s450_s6, %s450_s6 }
  0x1c   :  { %p457_p0 = por %p456_p13, %p455_p12 }
  0x1e   :  { %p458_p1 = pnand %p457_p0, %p451_p11 }
  0x20   :  { %461 = shalt.err (!%p458_p1)
}
  0x21   :  { %30 = dma.hbm_to_vmem [thread:$0]  %s556_s1, 1024, %s28_s15, [#allocation6]  }
  0x22   :  { %484 = dma.done.wait [#allocation3], 256  }
  0x23   :  { %485 = vsyncadd [#allocation3], 4294967040 }
  0x24   :  { %486 = dma.done.wait [#allocation6], 1024  }
  0x25   :  { %487 = vsyncadd [#allocation6], 4294966272  ;;  %v62_v0 = vlaneseq  ;;  %v492_v1 = vmov 1983009808   ;;  %vm99_vm0 = vcmask 531456   ;;  %v39_v10 = vld [vmem:[#allocation2] sm:$0xff] }
  0x26   :  { %v60_v2 = vunpack.c.l.s4 %v492_v1  ;;  %v42_v6 = vld [vmem:[#allocation5 + $0x8] sm:$0x3f]  ;;  %v41_v7 = vld [vmem:[#allocation5] sm:$0x3f]  ;;  %v44_v11 = vld [vmem:[#allocation5 + $0x18] sm:$0x3f]  ;;  %v58_v12 = vcombine.high %v39_v10, %v39_v10 }
  0x27   :  { %v63_v3 = vshrl.u32 %v62_v0, 7  ;;  %v46_v8 = vld [vmem:[#allocation5 + $0x28] sm:$0x3f]  ;;  %105 = vmatprep.subr.mxu1 %v42_v6  ;;  %v45_v9 = vld [vmem:[#allocation5 + $0x20] sm:$0x3f]  ;;  %v40_v14 = vld [vmem:[#allocation2 + $0x8] sm:$0xff] }
  0x28   :  { %v61_v4 = vunpack.c.0.s8 %v60_v2  ;;  %245 = vmatprep.subr.mxu0 %v46_v8  ;;  %106 = vmatpush1.xpose.msra.mxu1 %v41_v7  ;;  %v48_v15 = vld [vmem:[#allocation5 + $0x38] sm:$0x3f]  ;;  %v75_v16 = vcombine.high %v40_v14, %v40_v14  ;;  %v43_v22 = vld [vmem:[#allocation5 + $0x10] sm:$0x3f]  ;;  %s493_s9 = smov [#allocation7]   ;;  %vm385_vm1 = vcmask 41984  }
  0x29   :  { %246 = vmatpush1.xpose.msra.mxu0 %v45_v9  ;;  %175 = vmatprep.subr.mxu1 %v44_v11  ;;  %v47_v23 = vld [vmem:[#allocation5 + $0x30] sm:$0x3f]  ;;  %s393_s10 = sshll.u32 %s493_s9, 4  ;;  %s394_s10 = int_to_ptr.vmem [resolvable:$true] %s393_s10 }
  0x2a   :  { %v64_v5 = vsub.s32 %v61_v4, %v63_v3  ;;  %404 = vmatprep.subr.msk.mxu0 %vm99_vm0, %v48_v15  ;;  %v403_v26 = vld [vmem:[%s557_s2] ss:$0 sm:$0xff]  ;;  %s462_s11 = scalar_lea.vmem %s394_s10, 32  ;;  %p467_p3 = scmp.lt.s32.totalorder %s394_s10, %s394_s10 }
  0x2b   :  { %p463_p2 = scmp.ne.s32.totalorder %s394_s10, %s462_s11  ;;  %p468_p4 = scmp.lt.s32.totalorder %s462_s11, %s462_s11 }
  0x2c   :  { %v65_v13 = vrot.slane %v39_v10, %v64_v5  ;;  %v82_v17 = vrot.slane %v40_v14, %v64_v5  ;;  %v72_v19 = vrot.slane %v58_v12, %v64_v5  ;;  %v89_v20 = vrot.slane %v75_v16, %v64_v5 }
  0x2d   :  { %p469_p5 = por %p468_p4, %p467_p3 }
  0x2e   :  { %v73_v18 = vcombine.high %v65_v13, %v65_v13  ;;  %v90_v21 = vcombine.high %v82_v17, %v82_v17  ;;  %v74_v24 = vcombine.high %v72_v19, %v72_v19  ;;  %v91_v25 = vcombine.high %v89_v20, %v89_v20 }
  0x2f   :  { %p470_p6 = pnand %p469_p5, %p463_p2 }
  0x30   :  { %169 = vmatprep.mubr.f32.mxu1 %v73_v18  ;;  %309 = vmatprep.mubr.f32.mxu0 %v90_v21 }
  0x31   :  { %170 = vmatmul.mubr.f32.vlgmr.msra.gmra.mrb[0].mxu1 %v65_v13  ;;  %310 = vmatmul.mubr.f32.vlgmr.msra.gmra.mrb[0].mxu0 %v82_v17 }
  0x32   :  { %176 = vmatpush1.xpose.msra.mxu1 %v43_v22  ;;  %316 = vmatpush1.xpose.msra.mxu0 %v47_v23 }
  0x33   :  { %239 = vmatprep.mubr.f32.mxu1 %v74_v24  ;;  %405 = vmatprep.mubr.msk.f32.mxu0 %vm99_vm0, %v91_v25 }
  0x39   :  { %240 = vmatmul.mubr.f32.vlgmr.msra.gmra.mrb[0].mxu1 %v72_v19  ;;  %380 = vmatmul.mubr.f32.vlgmr.msra.gmra.mrb[0].mxu0 %v89_v20 }
 0x10c   :  { %v241_v27 = vpop.f32.mrb[0].mxu1  ;;  %v381_v29 = vpop.f32.mrb[0].mxu0 }
 0x10d   :  { %v406_v28 = vadd.f32 %v403_v26, %v241_v27  ;;  %v243_v30 = vpop.f32.mrb[1].mxu1  ;;  %v383_v31 = vpop.f32.mrb[1].mxu0 }
 0x10f   :  { %v407_v32 = vadd.f32 %v406_v28, %v381_v29 }
 0x111   :  { %386 = vst.msk [vmem:[#allocation7] sm:$0x3] %vm385_vm1, %v407_v32 }
 0x112   :  { %473 = shalt.err (!%p470_p6)
}
 0x113   :  { %s474_s13 = scalar_lea.hbm %s558_s3, 32 }
 0x114   :  { %p475_p7 = scmp.ne.s32.totalorder %s558_s3, %s474_s13  ;;  %p478_p8 = scmp.lt.u32.totalorder %s474_s13, %s558_s3 }
 0x116   :  { %p480_p9 = pnand %p478_p8, %p475_p7 }
 0x118   :  { %483 = shalt.err (!%p480_p9)
}
 0x119   :  { %396 = dma.vmem_to_hbm [thread:$0]  %s394_s10, 32, %s558_s3, [#allocation4]  }
 0x11a   :  { %488 = dma.done.wait [#allocation4], 32  }
 0x11b   :  { %489 = vsyncadd [#allocation4], 4294967264 }
 0x11c   :  { %400 = vsyncpa [#allocation3], 1 }
 0x11d   :  { %401 = vsyncpa [#allocation6], 1 }
 0x11e   :  { %402 = vsyncpa [#allocation4], 1 }

</bundles_post_ra>
